<compile_context>
chip_gen: v6e
topology: v6e:2x2x1
jax: 0.10.0
libtpu: 0.0.40
codegen_flags: <defaults>
</compile_context>

<pallas_src>
import functools
import math

import jax
import jax.numpy as jnp
from jax.experimental import pallas as pl
from jax.experimental.pallas import tpu as pltpu


def _same_pad(size, k, s, d=1):
    """TF-style 'SAME' padding total for one spatial dim (Conv2dSame)."""
    out = math.ceil(size / s)
    pad = max((out - 1) * s + (k - 1) * d + 1 - size, 0)
    return pad // 2, pad - pad // 2, out


def _round_up(x, m):
    return ((x + m - 1) // m) * m


def _spec(shape, index_map, n_buffers=None):
    """BlockSpec with optional buffer-count override; falls back if unsupported."""
    if n_buffers is not None:
        try:
            return pl.BlockSpec(shape, index_map, pipeline_mode=pl.Buffered(n_buffers))
        except Exception:
            pass
    return pl.BlockSpec(shape, index_map)


# ----------------------------- kernels ------------------------------------- #

def _conv_stats_kernel(*refs, taps, n_phase_refs):
    """Pass 1: tap-accumulated conv (bf16 MXU, f32 acc) + masked per-channel sums.

    refs = (mask, w_taps, *phase_blocks, y_out, sum_out, sq_out)
    taps: tuple of (tap_idx, cur_phase_idx, next_phase_idx, flat_shift).
    """
    mask_ref, w_ref = refs[0], refs[1]
    phase_refs = refs[2:2 + n_phase_refs]
    y_ref, sum_ref, sq_ref = refs[2 + n_phase_refs:]

    @pl.when(pl.program_id(1) == 0)
    def _():
        sum_ref[...] = jnp.zeros_like(sum_ref)
        sq_ref[...] = jnp.zeros_like(sq_ref)

    tm = y_ref.shape[1]
    ph = [r[...] for r in phase_refs]                     # (Cin, TM) bf16 each
    # pre-concatenate cur||next once per phase that has shifted taps
    ph2 = {}
    for _, cur, nxt, shift in taps:
        if shift > 0 and cur not in ph2:
            ph2[cur] = jnp.concatenate([ph[cur], ph[nxt]], axis=1)

    acc = jnp.zeros(y_ref.shape, jnp.float32)
    for t, cur, _, shift in taps:
        win = ph[cur] if shift == 0 else ph2[cur][:, shift:shift + tm]
        acc += jnp.dot(w_ref[t], win, preferred_element_type=jnp.float32)

    y_ref[...] = acc.astype(y_ref.dtype)                  # bf16 intermediate
    ym = acc * mask_ref[...]                              # drop halo / pad lanes from stats
    sum_ref[...] += jnp.sum(ym, axis=1, keepdims=True)[None]
    sq_ref[...] += jnp.sum(ym * acc, axis=1, keepdims=True)[None]


def _conv_act_kernel(*refs, taps, n_phase_refs, neg_slope):
    """apply_norm=False path: tap-accumulated conv + LeakyReLU only."""
    w_ref = refs[0]
    phase_refs = refs[1:1 + n_phase_refs]
    o_ref = refs[-1]

    tm = o_ref.shape[1]
    ph = [r[...] for r in phase_refs]
    ph2 = {}
    for _, cur, nxt, shift in taps:
        if shift > 0 and cur not in ph2:
            ph2[cur] = jnp.concatenate([ph[cur], ph[nxt]], axis=1)

    acc = jnp.zeros(o_ref.shape, jnp.float32)
    for t, cur, _, shift in taps:
        win = ph[cur] if shift == 0 else ph2[cur][:, shift:shift + tm]
        acc += jnp.dot(w_ref[t], win, preferred_element_type=jnp.float32)
    o_ref[...] = jnp.where(acc > 0, acc, neg_slope * acc)


def _bn_act_kernel(y_ref, scale_ref, shift_ref, o_ref, *, neg_slope):
    """Pass 2: apply precomputed BN scale/shift (f32) + LeakyReLU."""
    y = y_ref[...].astype(jnp.float32) * scale_ref[...] + shift_ref[...]
    o_ref[...] = jnp.where(y > 0, y, neg_slope * y)


# ----------------------------- wrapper -------------------------------------- #

def downsampling_forward(x_nchw, weight, gamma, beta,
                         strides=2, apply_norm=True, eps=1e-5, neg_slope=0.3):
    """x_nchw: (N, Cin, H, W); weight: (Cout, Cin, KH, KW) (PyTorch layout)."""
    N, Cin, H, W = x_nchw.shape
    Cout, _, KH, KW = weight.shape
    S = int(strides)

    pt, pb, OH = _same_pad(H, KH, S)
    pl_, pr, OW = _same_pad(W, KW, S)
    xp = jnp.pad(x_nchw, ((0, 0), (0, 0), (pt, pb), (pl_, pr)))
    Hp, Wp = xp.shape[2], xp.shape[3]

    dH, dW = (KH - 1) // S, (KW - 1) // S
    OHp, OWp = OH + dH, OW + dW          # output grid extended by the tap halo
    Mp = N * OHp * OWp                   # padded flat output grid
    M_valid = N * OH * OW                # true conv outputs (BatchNorm divisor)
    Cout_pad = _round_up(Cout, 8)
    smax = dH * OWp + dW                 # largest flat tap shift

    # taps -> (phase key, flat shift within that phase plane)
    tap_info = []
    for kh in range(KH):
        for kw in range(KW):
            tap_info.append(((kh % S, kw % S), (kh // S) * OWp + (kw // S)))
    used = sorted({p for p, _ in tap_info})
    need_next = sorted({p for p, s in tap_info if s > 0})
    n_streams = len(used) + len(need_next)

    # --- generation-aware VMEM budget / lane-tile size -----------------------
    try:
        vmem_cap = int(pltpu.get_tpu_info().vmem_capacity_bytes)
    except Exception:
        vmem_cap = 64 * 1024 * 1024
    vmem_limit = min(int(0.75 * vmem_cap), 100 * 1024 * 1024)

    bytes_per_tm = (2 * n_streams * Cin * 2            # double-buffered bf16 phase blocks
                    + 2 * len(need_next) * Cin * 2     # in-kernel cur||next temporaries
                    + 2 * Cin * 2                      # shifted-window temporary
                    + 2 * 4                            # mask (1 f32 row, double-buffered)
                    + 2 * Cout_pad * 2                 # bf16 y blocks (double-buffered)
                    + Cout_pad * 4)                    # f32 accumulator
    fixed = KH * KW * Cout_pad * Cin * 2 * 2           # weight (worst case double-buffered)
    tm = max(128, (int(0.45 * vmem_limit) - fixed) // bytes_per_tm)
    TM = min((tm // 128) * 128, 2048, _round_up(Mp, 128))
    TM = max(TM, _round_up(smax + 1, 128), 128)        # halo must fit inside one extra block

    n_blocks = -(-Mp // TM)
    NC = 2 if (apply_norm and n_blocks >= 2) else 1    # explicit core split for the stats pass
    n_blocks = _round_up(n_blocks, NC)
    TPC = n_blocks // NC
    L_out = n_blocks * TM
    L_in = L_out + TM                                  # + one zero block for the 'next' stream

    # --- stride-phase planes (Cin, L_in), bf16 --------------------------------
    xpe = jnp.pad(xp, ((0, 0), (0, 0), (0, S * OHp - Hp), (0, S * OWp - Wp)))
    xpe = xpe.astype(jnp.bfloat16)
    phase_flat = {}
    for p in used:
        rp, cp = p
        ph = xpe[:, :, rp::S, cp::S]                               # (N, Cin, OHp, OWp)
        ph = jnp.transpose(ph, (1, 0, 2, 3)).reshape(Cin, Mp)
        phase_flat[p] = jnp.pad(ph, ((0, 0), (0, L_in - Mp)))

    # validity mask: 1 for real outputs, 0 for halo rows/cols and tail padding
    mask = jnp.zeros((N, OHp, OWp), jnp.float32).at[:, :OH, :OW].set(1.0)
    mask = jnp.pad(mask.reshape(1, Mp), ((0, 0), (0, L_out - Mp)))

    # per-tap weights (T, Cout_pad, Cin), bf16
    w_taps = jnp.transpose(weight, (2, 3, 0, 1)).reshape(KH * KW, Cout, Cin)
    w_taps = jnp.pad(w_taps, ((0, 0), (0, Cout_pad - Cout), (0, 0))).astype(jnp.bfloat16)
    w_nbuf = 1 if (w_taps.size * 2) > (2 << 20) else None   # single-buffer only when it pays

    # phase input streams: one 'current' block per used phase, plus 'next' where needed
    cur_pos = {p: i for i, p in enumerate(used)}
    nxt_pos = {p: len(used) + i for i, p in enumerate(need_next)}
    phase_args = [phase_flat[p] for p in used] + [phase_flat[p] for p in need_next]
    taps = tuple((t, cur_pos[p], nxt_pos.get(p, -1), s)
                 for t, (p, s) in enumerate(tap_info))
    n_phase_refs = len(phase_args)

    conv_flops = 2 * L_out * KH * KW * Cin * Cout_pad
    conv_bytes = (2 * n_phase_refs * Cin * L_out + w_taps.size * 2
                  + Cout_pad * L_out * 2 + L_out * 4)

    if apply_norm:
        def cur_map(c, i):
            return (0, c * TPC + i)

        def nxt_map(c, i):
            return (0, c * TPC + i + 1)

        in_specs = ([_spec((1, TM), cur_map),
                     _spec(tuple(w_taps.shape), lambda c, i: (0, 0, 0), n_buffers=w_nbuf)]
                    + [_spec((Cin, TM), cur_map) for _ in used]
                    + [_spec((Cin, TM), nxt_map) for _ in need_next])
        out_specs = (pl.BlockSpec((Cout_pad, TM), cur_map),
                     pl.BlockSpec((1, Cout_pad, 1), lambda c, i: (c, 0, 0)),
                     pl.BlockSpec((1, Cout_pad, 1), lambda c, i: (c, 0, 0)))

        # Pass 1: conv + per-core per-channel sum / sum-of-squares (masked).
        y, psum, psq = pl.pallas_call(
            functools.partial(_conv_stats_kernel, taps=taps, n_phase_refs=n_phase_refs),
            out_shape=(jax.ShapeDtypeStruct((Cout_pad, L_out), jnp.bfloat16),
                       jax.ShapeDtypeStruct((NC, Cout_pad, 1), jnp.float32),
                       jax.ShapeDtypeStruct((NC, Cout_pad, 1), jnp.float32)),
            grid=(NC, TPC),
            in_specs=in_specs,
            out_specs=out_specs,
            compiler_params=pltpu.CompilerParams(
                dimension_semantics=("parallel", "arbitrary"),
                vmem_limit_bytes=vmem_limit),
            cost_estimate=pl.CostEstimate(flops=conv_flops, transcendentals=0,
                                          bytes_accessed=conv_bytes),
        )(mask, w_taps, *phase_args)

        # Combine per-core partials; train-mode (biased) batch statistics.
        s1 = jnp.sum(psum, axis=0)                                  # (Cout_pad, 1)
        s2 = jnp.sum(psq, axis=0)
        mean = s1 / float(M_valid)
        var = jnp.maximum(s2 / float(M_valid) - mean * mean, 0.0)   # clamp cancellation
        g = jnp.pad(gamma.astype(jnp.float32), (0, Cout_pad - Cout),
                    constant_values=1.0).reshape(Cout_pad, 1)
        b = jnp.pad(beta.astype(jnp.float32), (0, Cout_pad - Cout)).reshape(Cout_pad, 1)
        scale = g * jax.lax.rsqrt(var + eps)
        shift = b - mean * scale

        # Pass 2: normalize + LeakyReLU, independent per M tile (megacore friendly).
        out_t = pl.pallas_call(
            functools.partial(_bn_act_kernel, neg_slope=neg_slope),
            out_shape=jax.ShapeDtypeStruct((Cout_pad, L_out), jnp.float32),
            grid=(n_blocks,),
            in_specs=[pl.BlockSpec((Cout_pad, TM), lambda i: (0, i)),
                      pl.BlockSpec((Cout_pad, 1), lambda i: (0, 0)),
                      pl.BlockSpec((Cout_pad, 1), lambda i: (0, 0))],
            out_specs=pl.BlockSpec((Cout_pad, TM), lambda i: (0, i)),
            compiler_params=pltpu.CompilerParams(
                dimension_semantics=("parallel",),
                vmem_limit_bytes=vmem_limit),
            cost_estimate=pl.CostEstimate(flops=4 * Cout_pad * L_out, transcendentals=0,
                                          bytes_accessed=Cout_pad * L_out * 6),
        )(y, scale, shift)
    else:
        def cur_map1(i):
            return (0, i)

        def nxt_map1(i):
            return (0, i + 1)

        in_specs = ([_spec(tuple(w_taps.shape), lambda i: (0, 0, 0), n_buffers=w_nbuf)]
                    + [_spec((Cin, TM), cur_map1) for _ in used]
                    + [_spec((Cin, TM), nxt_map1) for _ in need_next])
        out_t = pl.pallas_call(
            functools.partial(_conv_act_kernel, taps=taps, n_phase_refs=n_phase_refs,
                              neg_slope=neg_slope),
            out_shape=jax.ShapeDtypeStruct((Cout_pad, L_out), jnp.float32),
            grid=(n_blocks,),
            in_specs=in_specs,
            out_specs=pl.BlockSpec((Cout_pad, TM), cur_map1),
            compiler_params=pltpu.CompilerParams(
                dimension_semantics=("parallel",),
                vmem_limit_bytes=vmem_limit),
            cost_estimate=pl.CostEstimate(flops=conv_flops, transcendentals=0,
                                          bytes_accessed=conv_bytes),
        )(w_taps, *phase_args)

    # drop channel padding, halo rows/cols and tail padding; back to NCHW
    out = out_t[:Cout, :Mp].reshape(Cout, N, OHp, OWp)[:, :, :OH, :OW]
    return jnp.transpose(out, (1, 0, 2, 3))


def _reference(x_nchw, weight, gamma, beta, strides=2, apply_norm=True,
               eps=1e-5, neg_slope=0.3):
    """Pure-JAX reference for correctness checking."""
    pt, pb, _ = _same_pad(x_nchw.shape[2], weight.shape[2], strides)
    pl_, pr, _ = _same_pad(x_nchw.shape[3], weight.shape[3], strides)
    y = jax.lax.conv_general_dilated(
        x_nchw.astype(jnp.float32), weight.astype(jnp.float32),
        window_strides=(strides, strides),
        padding=[(pt, pb), (pl_, pr)],
        dimension_numbers=("NCHW", "OIHW", "NCHW"))
    if apply_norm:
        mean = jnp.mean(y, axis=(0, 2, 3), keepdims=True)
        var = jnp.mean((y - mean) ** 2, axis=(0, 2, 3), keepdims=True)
        y = (y - mean) * jax.lax.rsqrt(var + eps)
        y = y * gamma.reshape(1, -1, 1, 1) + beta.reshape(1, -1, 1, 1)
    return jnp.where(y > 0, y, neg_slope * y)


if __name__ == "__main__":
    key = jax.random.PRNGKey(0)
    kx, kw = jax.random.split(key)

    N, Cin, H, W = 2, 4, 16, 16
    Cout, KH, KW = 8, 3, 3

    x = jax.random.normal(kx, (N, Cin, H, W), dtype=jnp.float32)
    # deterministic synthetic params (mirror nn.Conv2d Kaiming-uniform bound)
    bound = 1.0 / math.sqrt(Cin * KH * KW)
    weight = jax.random.uniform(kw, (Cout, Cin, KH, KW), dtype=jnp.float32,
                                minval=-bound, maxval=bound)
    gamma = jnp.ones((Cout,), jnp.float32)   # nn.BatchNorm2d default init
    beta = jnp.zeros((Cout,), jnp.float32)

    fwd = jax.jit(functools.partial(downsampling_forward,
                                    strides=2, apply_norm=True))
    out = jax.block_until_ready(fwd(x, weight, gamma, beta))

    # Reference on bf16-rounded conv inputs (the kernel feeds the MXU bf16 operands
    # with f32 accumulation and stores the conv intermediate in bf16 between passes
    # — a deliberate precision trade-off, hence the slightly looser tolerance).
    x_q = x.astype(jnp.bfloat16).astype(jnp.float32)
    w_q = weight.astype(jnp.bfloat16).astype(jnp.float32)
    ref = _reference(x_q, w_q, gamma, beta, strides=2, apply_norm=True)

    assert out.shape == (N, Cout, 8, 8), out.shape
    err = float(jnp.max(jnp.abs(out - ref)))
    assert jnp.allclose(out, ref, atol=2e-2, rtol=2e-2), err

    print("KERNEL_OK")
</pallas_src>

<mosaic_0001>
module attributes {stable_mosaic.version = 11 : i64} {
  func.func @_conv_stats_kernel(%arg0: i32, %arg1: i32, %arg2: memref<1x256xf32, #tpu.memory_space<vmem>>, %arg3: memref<9x8x4xbf16, #tpu.memory_space<vmem>>, %arg4: memref<4x256xbf16, #tpu.memory_space<vmem>>, %arg5: memref<4x256xbf16, #tpu.memory_space<vmem>>, %arg6: memref<4x256xbf16, #tpu.memory_space<vmem>>, %arg7: memref<4x256xbf16, #tpu.memory_space<vmem>>, %arg8: memref<4x256xbf16, #tpu.memory_space<vmem>>, %arg9: memref<4x256xbf16, #tpu.memory_space<vmem>>, %arg10: memref<4x256xbf16, #tpu.memory_space<vmem>>, %arg11: memref<8x256xbf16, #tpu.memory_space<vmem>>, %arg12: memref<1x8x1xf32, #tpu.memory_space<vmem>>, %arg13: memref<1x8x1xf32, #tpu.memory_space<vmem>>) attributes {dimension_semantics = [#tpu.dimension_semantics<parallel>, #tpu.dimension_semantics<arbitrary>], iteration_bounds = array<i64: 1, 1>, scalar_prefetch = 0 : i64, scratch_operands = 0 : i64, tpu.core_type = #tpu.core_type<tc>, window_params = [{transform_indices = @transform_0, window_bounds = array<i64: 1, 256>}, {pipeline_mode = #tpu.pipeline_mode<synchronous>, transform_indices = @transform_1, window_bounds = array<i64: 9, 8, 4>}, {transform_indices = @transform_2, window_bounds = array<i64: 4, 256>}, {transform_indices = @transform_3, window_bounds = array<i64: 4, 256>}, {transform_indices = @transform_4, window_bounds = array<i64: 4, 256>}, {transform_indices = @transform_5, window_bounds = array<i64: 4, 256>}, {transform_indices = @transform_6, window_bounds = array<i64: 4, 256>}, {transform_indices = @transform_7, window_bounds = array<i64: 4, 256>}, {transform_indices = @transform_8, window_bounds = array<i64: 4, 256>}, {transform_indices = @transform_9, window_bounds = array<i64: 8, 256>}, {transform_indices = @transform_10, window_bounds = array<i64: 1, 8, 1>}, {transform_indices = @transform_11, window_bounds = array<i64: 1, 8, 1>}]} {
    %c0_i32 = arith.constant 0 : i32
    %0 = arith.cmpi eq, %arg1, %c0_i32 : i32
    %1 = arith.extui %0 : i1 to i32
    %c0_i32_0 = arith.constant 0 : i32
    %2 = arith.cmpi ne, %1, %c0_i32_0 : i32
    scf.if %2 {
      %cst_60 = arith.constant 0.000000e+00 : f32
      %73 = vector.broadcast %cst_60 : f32 to vector<1x8x1xf32>
      %c0_61 = arith.constant 0 : index
      %c0_62 = arith.constant 0 : index
      %c0_63 = arith.constant 0 : index
      %74 = vector.load %arg12[%c0_61, %c0_62, %c0_63] : memref<1x8x1xf32, #tpu.memory_space<vmem>>, vector<1x8x1xf32>
      tpu.vector_store %arg12[%c0_61, %c0_62, %c0_63], %73 {strides = array<i32>} : memref<1x8x1xf32, #tpu.memory_space<vmem>>, vector<1x8x1xf32>,
      %cst_64 = arith.constant 0.000000e+00 : f32
      %75 = vector.broadcast %cst_64 : f32 to vector<1x8x1xf32>
      %c0_65 = arith.constant 0 : index
      %c0_66 = arith.constant 0 : index
      %c0_67 = arith.constant 0 : index
      %76 = vector.load %arg13[%c0_65, %c0_66, %c0_67] : memref<1x8x1xf32, #tpu.memory_space<vmem>>, vector<1x8x1xf32>
      tpu.vector_store %arg13[%c0_65, %c0_66, %c0_67], %75 {strides = array<i32>} : memref<1x8x1xf32, #tpu.memory_space<vmem>>, vector<1x8x1xf32>,
    } else {
    }
    %c0 = arith.constant 0 : index
    %c0_1 = arith.constant 0 : index
    %3 = vector.load %arg4[%c0, %c0_1] : memref<4x256xbf16, #tpu.memory_space<vmem>>, vector<4x256xbf16>
    %c0_2 = arith.constant 0 : index
    %c0_3 = arith.constant 0 : index
    %4 = vector.load %arg5[%c0_2, %c0_3] : memref<4x256xbf16, #tpu.memory_space<vmem>>, vector<4x256xbf16>
    %c0_4 = arith.constant 0 : index
    %c0_5 = arith.constant 0 : index
    %5 = vector.load %arg6[%c0_4, %c0_5] : memref<4x256xbf16, #tpu.memory_space<vmem>>, vector<4x256xbf16>
    %c0_6 = arith.constant 0 : index
    %c0_7 = arith.constant 0 : index
    %6 = vector.load %arg7[%c0_6, %c0_7] : memref<4x256xbf16, #tpu.memory_space<vmem>>, vector<4x256xbf16>
    %c0_8 = arith.constant 0 : index
    %c0_9 = arith.constant 0 : index
    %7 = vector.load %arg8[%c0_8, %c0_9] : memref<4x256xbf16, #tpu.memory_space<vmem>>, vector<4x256xbf16>
    %c0_10 = arith.constant 0 : index
    %c0_11 = arith.constant 0 : index
    %8 = vector.load %arg9[%c0_10, %c0_11] : memref<4x256xbf16, #tpu.memory_space<vmem>>, vector<4x256xbf16>
    %c0_12 = arith.constant 0 : index
    %c0_13 = arith.constant 0 : index
    %9 = vector.load %arg10[%c0_12, %c0_13] : memref<4x256xbf16, #tpu.memory_space<vmem>>, vector<4x256xbf16>
    %10 = tpu.concatenate %3, %7 in 1 : vector<4x256xbf16>, vector<4x256xbf16> -> vector<4x512xbf16>
    %11 = tpu.concatenate %5, %9 in 1 : vector<4x256xbf16>, vector<4x256xbf16> -> vector<4x512xbf16>
    %12 = tpu.concatenate %4, %8 in 1 : vector<4x256xbf16>, vector<4x256xbf16> -> vector<4x512xbf16>
    %cst = arith.constant 0.000000e+00 : f32
    %13 = vector.broadcast %cst : f32 to vector<8x256xf32>
    %c0_14 = arith.constant 0 : index
    %c0_15 = arith.constant 0 : index
    %c0_16 = arith.constant 0 : index
    %14 = vector.load %arg3[%c0_14, %c0_15, %c0_16] : memref<9x8x4xbf16, #tpu.memory_space<vmem>>, vector<1x8x4xbf16>
    %15 = vector.shape_cast %14 : vector<1x8x4xbf16> to vector<8x4xbf16>
    %cst_17 = arith.constant dense<0.000000e+00> : vector<8x256xf32>
    %16 = tpu.matmul %15, %3, %cst_17 {dimension_numbers = #tpu.dot_dimension_numbers<[1], [0], [0], [1], [0, 0, 1, 1], [], []>} : vector<8x4xbf16>, vector<4x256xbf16>, vector<8x256xf32> -> vector<8x256xf32>
    %17 = arith.addf %13, %16 : vector<8x256xf32>
    %c1 = arith.constant 1 : index
    %c0_18 = arith.constant 0 : index
    %c0_19 = arith.constant 0 : index
    %18 = vector.load %arg3[%c1, %c0_18, %c0_19] : memref<9x8x4xbf16, #tpu.memory_space<vmem>>, vector<1x8x4xbf16>
    %19 = vector.shape_cast %18 : vector<1x8x4xbf16> to vector<8x4xbf16>
    %cst_20 = arith.constant dense<0.000000e+00> : vector<8x256xf32>
    %20 = tpu.matmul %19, %4, %cst_20 {dimension_numbers = #tpu.dot_dimension_numbers<[1], [0], [0], [1], [0, 0, 1, 1], [], []>} : vector<8x4xbf16>, vector<4x256xbf16>, vector<8x256xf32> -> vector<8x256xf32>
    %21 = arith.addf %17, %20 : vector<8x256xf32>
    %22 = vector.extract_strided_slice %10 {offsets = [0, 1], sizes = [4, 256], strides = [1, 1]} : vector<4x512xbf16> to vector<4x256xbf16>
    %c2 = arith.constant 2 : index
    %c0_21 = arith.constant 0 : index
    %c0_22 = arith.constant 0 : index
    %23 = vector.load %arg3[%c2, %c0_21, %c0_22] : memref<9x8x4xbf16, #tpu.memory_space<vmem>>, vector<1x8x4xbf16>
    %24 = vector.shape_cast %23 : vector<1x8x4xbf16> to vector<8x4xbf16>
    %cst_23 = arith.constant dense<0.000000e+00> : vector<8x256xf32>
    %25 = tpu.matmul %24, %22, %cst_23 {dimension_numbers = #tpu.dot_dimension_numbers<[1], [0], [0], [1], [0, 0, 1, 1], [], []>} : vector<8x4xbf16>, vector<4x256xbf16>, vector<8x256xf32> -> vector<8x256xf32>
    %26 = arith.addf %21, %25 : vector<8x256xf32>
    %c3 = arith.constant 3 : index
    %c0_24 = arith.constant 0 : index
    %c0_25 = arith.constant 0 : index
    %27 = vector.load %arg3[%c3, %c0_24, %c0_25] : memref<9x8x4xbf16, #tpu.memory_space<vmem>>, vector<1x8x4xbf16>
    %28 = vector.shape_cast %27 : vector<1x8x4xbf16> to vector<8x4xbf16>
    %cst_26 = arith.constant dense<0.000000e+00> : vector<8x256xf32>
    %29 = tpu.matmul %28, %5, %cst_26 {dimension_numbers = #tpu.dot_dimension_numbers<[1], [0], [0], [1], [0, 0, 1, 1], [], []>} : vector<8x4xbf16>, vector<4x256xbf16>, vector<8x256xf32> -> vector<8x256xf32>
    %30 = arith.addf %26, %29 : vector<8x256xf32>
    %c4 = arith.constant 4 : index
    %c0_27 = arith.constant 0 : index
    %c0_28 = arith.constant 0 : index
    %31 = vector.load %arg3[%c4, %c0_27, %c0_28] : memref<9x8x4xbf16, #tpu.memory_space<vmem>>, vector<1x8x4xbf16>
    %32 = vector.shape_cast %31 : vector<1x8x4xbf16> to vector<8x4xbf16>
    %cst_29 = arith.constant dense<0.000000e+00> : vector<8x256xf32>
    %33 = tpu.matmul %32, %6, %cst_29 {dimension_numbers = #tpu.dot_dimension_numbers<[1], [0], [0], [1], [0, 0, 1, 1], [], []>} : vector<8x4xbf16>, vector<4x256xbf16>, vector<8x256xf32> -> vector<8x256xf32>
    %34 = arith.addf %30, %33 : vector<8x256xf32>
    %35 = vector.extract_strided_slice %11 {offsets = [0, 1], sizes = [4, 256], strides = [1, 1]} : vector<4x512xbf16> to vector<4x256xbf16>
    %c5 = arith.constant 5 : index
    %c0_30 = arith.constant 0 : index
    %c0_31 = arith.constant 0 : index
    %36 = vector.load %arg3[%c5, %c0_30, %c0_31] : memref<9x8x4xbf16, #tpu.memory_space<vmem>>, vector<1x8x4xbf16>
    %37 = vector.shape_cast %36 : vector<1x8x4xbf16> to vector<8x4xbf16>
    %cst_32 = arith.constant dense<0.000000e+00> : vector<8x256xf32>
    %38 = tpu.matmul %37, %35, %cst_32 {dimension_numbers = #tpu.dot_dimension_numbers<[1], [0], [0], [1], [0, 0, 1, 1], [], []>} : vector<8x4xbf16>, vector<4x256xbf16>, vector<8x256xf32> -> vector<8x256xf32>
    %39 = arith.addf %34, %38 : vector<8x256xf32>
    %40 = vector.extract_strided_slice %10 {offsets = [0, 9], sizes = [4, 256], strides = [1, 1]} : vector<4x512xbf16> to vector<4x256xbf16>
    %c6 = arith.constant 6 : index
    %c0_33 = arith.constant 0 : index
    %c0_34 = arith.constant 0 : index
    %41 = vector.load %arg3[%c6, %c0_33, %c0_34] : memref<9x8x4xbf16, #tpu.memory_space<vmem>>, vector<1x8x4xbf16>
    %42 = vector.shape_cast %41 : vector<1x8x4xbf16> to vector<8x4xbf16>
    %cst_35 = arith.constant dense<0.000000e+00> : vector<8x256xf32>
    %43 = tpu.matmul %42, %40, %cst_35 {dimension_numbers = #tpu.dot_dimension_numbers<[1], [0], [0], [1], [0, 0, 1, 1], [], []>} : vector<8x4xbf16>, vector<4x256xbf16>, vector<8x256xf32> -> vector<8x256xf32>
    %44 = arith.addf %39, %43 : vector<8x256xf32>
    %45 = vector.extract_strided_slice %12 {offsets = [0, 9], sizes = [4, 256], strides = [1, 1]} : vector<4x512xbf16> to vector<4x256xbf16>
    %c7 = arith.constant 7 : index
    %c0_36 = arith.constant 0 : index
    %c0_37 = arith.constant 0 : index
    %46 = vector.load %arg3[%c7, %c0_36, %c0_37] : memref<9x8x4xbf16, #tpu.memory_space<vmem>>, vector<1x8x4xbf16>
    %47 = vector.shape_cast %46 : vector<1x8x4xbf16> to vector<8x4xbf16>
    %cst_38 = arith.constant dense<0.000000e+00> : vector<8x256xf32>
    %48 = tpu.matmul %47, %45, %cst_38 {dimension_numbers = #tpu.dot_dimension_numbers<[1], [0], [0], [1], [0, 0, 1, 1], [], []>} : vector<8x4xbf16>, vector<4x256xbf16>, vector<8x256xf32> -> vector<8x256xf32>
    %49 = arith.addf %44, %48 : vector<8x256xf32>
    %50 = vector.extract_strided_slice %10 {offsets = [0, 10], sizes = [4, 256], strides = [1, 1]} : vector<4x512xbf16> to vector<4x256xbf16>
    %c8 = arith.constant 8 : index
    %c0_39 = arith.constant 0 : index
    %c0_40 = arith.constant 0 : index
    %51 = vector.load %arg3[%c8, %c0_39, %c0_40] : memref<9x8x4xbf16, #tpu.memory_space<vmem>>, vector<1x8x4xbf16>
    %52 = vector.shape_cast %51 : vector<1x8x4xbf16> to vector<8x4xbf16>
    %cst_41 = arith.constant dense<0.000000e+00> : vector<8x256xf32>
    %53 = tpu.matmul %52, %50, %cst_41 {dimension_numbers = #tpu.dot_dimension_numbers<[1], [0], [0], [1], [0, 0, 1, 1], [], []>} : vector<8x4xbf16>, vector<4x256xbf16>, vector<8x256xf32> -> vector<8x256xf32>
    %54 = arith.addf %49, %53 : vector<8x256xf32>
    %55 = arith.truncf %54 : vector<8x256xf32> to vector<8x256xbf16>
    %c0_42 = arith.constant 0 : index
    %c0_43 = arith.constant 0 : index
    %56 = vector.load %arg11[%c0_42, %c0_43] : memref<8x256xbf16, #tpu.memory_space<vmem>>, vector<8x256xbf16>
    tpu.vector_store %arg11[%c0_42, %c0_43], %55 {strides = array<i32>} : memref<8x256xbf16, #tpu.memory_space<vmem>>, vector<8x256xbf16>,
    %c0_44 = arith.constant 0 : index
    %c0_45 = arith.constant 0 : index
    %57 = vector.load %arg2[%c0_44, %c0_45] : memref<1x256xf32, #tpu.memory_space<vmem>>, vector<1x256xf32>
    %58 = vector.broadcast %57 : vector<1x256xf32> to vector<8x256xf32>
    %59 = arith.mulf %54, %58 : vector<8x256xf32>
    %c0_46 = arith.constant 0 : index
    %c0_47 = arith.constant 0 : index
    %c0_48 = arith.constant 0 : index
    %60 = vector.load %arg12[%c0_46, %c0_47, %c0_48] : memref<1x8x1xf32, #tpu.memory_space<vmem>>, vector<1x8x1xf32>
    %cst_49 = arith.constant dense<0.000000e+00> : vector<8xf32>
    %61 = vector.multi_reduction <add>, %59, %cst_49 [1] : vector<8x256xf32> to vector<8xf32>
    %62 = vector.shape_cast %61 : vector<8xf32> to vector<8x1xf32>
    %63 = vector.shape_cast %62 : vector<8x1xf32> to vector<1x8x1xf32>
    %64 = arith.addf %60, %63 : vector<1x8x1xf32>
    %c0_50 = arith.constant 0 : index
    %c0_51 = arith.constant 0 : index
    %c0_52 = arith.constant 0 : index
    %65 = vector.load %arg12[%c0_50, %c0_51, %c0_52] : memref<1x8x1xf32, #tpu.memory_space<vmem>>, vector<1x8x1xf32>
    tpu.vector_store %arg12[%c0_50, %c0_51, %c0_52], %64 {strides = array<i32>} : memref<1x8x1xf32, #tpu.memory_space<vmem>>, vector<1x8x1xf32>,
    %c0_53 = arith.constant 0 : index
    %c0_54 = arith.constant 0 : index
    %c0_55 = arith.constant 0 : index
    %66 = vector.load %arg13[%c0_53, %c0_54, %c0_55] : memref<1x8x1xf32, #tpu.memory_space<vmem>>, vector<1x8x1xf32>
    %67 = arith.mulf %59, %54 : vector<8x256xf32>
    %cst_56 = arith.constant dense<0.000000e+00> : vector<8xf32>
    %68 = vector.multi_reduction <add>, %67, %cst_56 [1] : vector<8x256xf32> to vector<8xf32>
    %69 = vector.shape_cast %68 : vector<8xf32> to vector<8x1xf32>
    %70 = vector.shape_cast %69 : vector<8x1xf32> to vector<1x8x1xf32>
    %71 = arith.addf %66, %70 : vector<1x8x1xf32>
    %c0_57 = arith.constant 0 : index
    %c0_58 = arith.constant 0 : index
    %c0_59 = arith.constant 0 : index
    %72 = vector.load %arg13[%c0_57, %c0_58, %c0_59] : memref<1x8x1xf32, #tpu.memory_space<vmem>>, vector<1x8x1xf32>
    tpu.vector_store %arg13[%c0_57, %c0_58, %c0_59], %71 {strides = array<i32>} : memref<1x8x1xf32, #tpu.memory_space<vmem>>, vector<1x8x1xf32>,
    return
  }
  func.func @transform_0(%arg0: i32, %arg1: i32) -> (i32, i32) {
    %c1_i32 = arith.constant 1 : i32
    %0 = arith.muli %arg0, %c1_i32 : i32
    %1 = arith.addi %0, %arg1 : i32
    %c0_i32 = arith.constant 0 : i32
    %c0_i32_0 = arith.constant 0 : i32
    return %c0_i32, %1 : i32, i32
  }
  func.func @transform_1(%arg0: i32, %arg1: i32) -> (i32, i32, i32) {
    %c0_i32 = arith.constant 0 : i32
    %c0_i32_0 = arith.constant 0 : i32
    %c0_i32_1 = arith.constant 0 : i32
    %c0_i32_2 = arith.constant 0 : i32
    return %c0_i32, %c0_i32_0, %c0_i32_1 : i32, i32, i32
  }
  func.func @transform_2(%arg0: i32, %arg1: i32) -> (i32, i32) {
    %c1_i32 = arith.constant 1 : i32
    %0 = arith.muli %arg0, %c1_i32 : i32
    %1 = arith.addi %0, %arg1 : i32
    %c0_i32 = arith.constant 0 : i32
    %c0_i32_0 = arith.constant 0 : i32
    return %c0_i32, %1 : i32, i32
  }
  func.func @transform_3(%arg0: i32, %arg1: i32) -> (i32, i32) {
    %c1_i32 = arith.constant 1 : i32
    %0 = arith.muli %arg0, %c1_i32 : i32
    %1 = arith.addi %0, %arg1 : i32
    %c0_i32 = arith.constant 0 : i32
    %c0_i32_0 = arith.constant 0 : i32
    return %c0_i32, %1 : i32, i32
  }
  func.func @transform_4(%arg0: i32, %arg1: i32) -> (i32, i32) {
    %c1_i32 = arith.constant 1 : i32
    %0 = arith.muli %arg0, %c1_i32 : i32
    %1 = arith.addi %0, %arg1 : i32
    %c0_i32 = arith.constant 0 : i32
    %c0_i32_0 = arith.constant 0 : i32
    return %c0_i32, %1 : i32, i32
  }
  func.func @transform_5(%arg0: i32, %arg1: i32) -> (i32, i32) {
    %c1_i32 = arith.constant 1 : i32
    %0 = arith.muli %arg0, %c1_i32 : i32
    %1 = arith.addi %0, %arg1 : i32
    %c0_i32 = arith.constant 0 : i32
    %c0_i32_0 = arith.constant 0 : i32
    return %c0_i32, %1 : i32, i32
  }
  func.func @transform_6(%arg0: i32, %arg1: i32) -> (i32, i32) {
    %c1_i32 = arith.constant 1 : i32
    %0 = arith.muli %arg0, %c1_i32 : i32
    %1 = arith.addi %0, %arg1 : i32
    %c1_i32_0 = arith.constant 1 : i32
    %2 = arith.addi %1, %c1_i32_0 : i32
    %c0_i32 = arith.constant 0 : i32
    %c0_i32_1 = arith.constant 0 : i32
    return %c0_i32, %2 : i32, i32
  }
  func.func @transform_7(%arg0: i32, %arg1: i32) -> (i32, i32) {
    %c1_i32 = arith.constant 1 : i32
    %0 = arith.muli %arg0, %c1_i32 : i32
    %1 = arith.addi %0, %arg1 : i32
    %c1_i32_0 = arith.constant 1 : i32
    %2 = arith.addi %1, %c1_i32_0 : i32
    %c0_i32 = arith.constant 0 : i32
    %c0_i32_1 = arith.constant 0 : i32
    return %c0_i32, %2 : i32, i32
  }
  func.func @transform_8(%arg0: i32, %arg1: i32) -> (i32, i32) {
    %c1_i32 = arith.constant 1 : i32
    %0 = arith.muli %arg0, %c1_i32 : i32
    %1 = arith.addi %0, %arg1 : i32
    %c1_i32_0 = arith.constant 1 : i32
    %2 = arith.addi %1, %c1_i32_0 : i32
    %c0_i32 = arith.constant 0 : i32
    %c0_i32_1 = arith.constant 0 : i32
    return %c0_i32, %2 : i32, i32
  }
  func.func @transform_9(%arg0: i32, %arg1: i32) -> (i32, i32) {
    %c1_i32 = arith.constant 1 : i32
    %0 = arith.muli %arg0, %c1_i32 : i32
    %1 = arith.addi %0, %arg1 : i32
    %c0_i32 = arith.constant 0 : i32
    %c0_i32_0 = arith.constant 0 : i32
    return %c0_i32, %1 : i32, i32
  }
  func.func @transform_10(%arg0: i32, %arg1: i32) -> (i32, i32, i32) {
    %c0_i32 = arith.constant 0 : i32
    %c0_i32_0 = arith.constant 0 : i32
    %c0_i32_1 = arith.constant 0 : i32
    return %arg0, %c0_i32, %c0_i32_0 : i32, i32, i32
  }
  func.func @transform_11(%arg0: i32, %arg1: i32) -> (i32, i32, i32) {
    %c0_i32 = arith.constant 0 : i32
    %c0_i32_0 = arith.constant 0 : i32
    %c0_i32_1 = arith.constant 0 : i32
    return %arg0, %c0_i32, %c0_i32_0 : i32, i32, i32
  }
}

module attributes {stable_mosaic.version = 11 : i64} {
  func.func @_bn_act_kernel(%arg0: i32, %arg1: memref<8x256xbf16, #tpu.memory_space<vmem>>, %arg2: memref<8x1xf32, #tpu.memory_space<vmem>>, %arg3: memref<8x1xf32, #tpu.memory_space<vmem>>, %arg4: memref<8x256xf32, #tpu.memory_space<vmem>>) attributes {dimension_semantics = [#tpu.dimension_semantics<parallel>], iteration_bounds = array<i64: 1>, scalar_prefetch = 0 : i64, scratch_operands = 0 : i64, tpu.core_type = #tpu.core_type<tc>, window_params = [{transform_indices = @transform_0, window_bounds = array<i64: 8, 256>}, {pipeline_mode = #tpu.pipeline_mode<synchronous>, transform_indices = @transform_1, window_bounds = array<i64: 8, 1>}, {pipeline_mode = #tpu.pipeline_mode<synchronous>, transform_indices = @transform_2, window_bounds = array<i64: 8, 1>}, {transform_indices = @transform_3, window_bounds = array<i64: 8, 256>}]} {
    %c0 = arith.constant 0 : index
    %c0_0 = arith.constant 0 : index
    %0 = vector.load %arg1[%c0, %c0_0] : memref<8x256xbf16, #tpu.memory_space<vmem>>, vector<8x256xbf16>
    %1 = arith.extf %0 : vector<8x256xbf16> to vector<8x256xf32>
    %c0_1 = arith.constant 0 : index
    %c0_2 = arith.constant 0 : index
    %2 = vector.load %arg2[%c0_1, %c0_2] : memref<8x1xf32, #tpu.memory_space<vmem>>, vector<8x1xf32>
    %3 = vector.broadcast %2 : vector<8x1xf32> to vector<8x256xf32>
    %4 = arith.mulf %1, %3 : vector<8x256xf32>
    %c0_3 = arith.constant 0 : index
    %c0_4 = arith.constant 0 : index
    %5 = vector.load %arg3[%c0_3, %c0_4] : memref<8x1xf32, #tpu.memory_space<vmem>>, vector<8x1xf32>
    %6 = vector.broadcast %5 : vector<8x1xf32> to vector<8x256xf32>
    %7 = arith.addf %4, %6 : vector<8x256xf32>
    %cst = arith.constant 0.000000e+00 : f32
    %8 = vector.broadcast %cst : f32 to vector<8x256xf32>
    %9 = arith.cmpf ogt, %7, %8 : vector<8x256xf32>
    %cst_5 = arith.constant 3.000000e-01 : f32
    %10 = vector.broadcast %cst_5 : f32 to vector<8x256xf32>
    %11 = arith.mulf %10, %7 : vector<8x256xf32>
    %12 = arith.select %9, %7, %11 : vector<8x256xi1>, vector<8x256xf32>
    %c0_6 = arith.constant 0 : index
    %c0_7 = arith.constant 0 : index
    %13 = vector.load %arg4[%c0_6, %c0_7] : memref<8x256xf32, #tpu.memory_space<vmem>>, vector<8x256xf32>
    tpu.vector_store %arg4[%c0_6, %c0_7], %12 {strides = array<i32>} : memref<8x256xf32, #tpu.memory_space<vmem>>, vector<8x256xf32>,
    return
  }
  func.func @transform_0(%arg0: i32) -> (i32, i32) {
    %c0_i32 = arith.constant 0 : i32
    %c0_i32_0 = arith.constant 0 : i32
    return %c0_i32, %arg0 : i32, i32
  }
  func.func @transform_1(%arg0: i32) -> (i32, i32) {
    %c0_i32 = arith.constant 0 : i32
    %c0_i32_0 = arith.constant 0 : i32
    %c0_i32_1 = arith.constant 0 : i32
    return %c0_i32, %c0_i32_0 : i32, i32
  }
  func.func @transform_2(%arg0: i32) -> (i32, i32) {
    %c0_i32 = arith.constant 0 : i32
    %c0_i32_0 = arith.constant 0 : i32
    %c0_i32_1 = arith.constant 0 : i32
    return %c0_i32, %c0_i32_0 : i32, i32
  }
  func.func @transform_3(%arg0: i32) -> (i32, i32) {
    %c0_i32 = arith.constant 0 : i32
    %c0_i32_0 = arith.constant 0 : i32
    return %c0_i32, %arg0 : i32, i32
  }
}

</mosaic_0001>

<bundles_post_ra>
// kernel: downsampling_forward.3
= control target key start
LH: loop header
LB: loop body
LE: loop exit
PB: predicated region body
PF: predicated region fallthrough
CT: control target
= control target key end

     0   :  { %v47_v0 = vmov 0   ;;  %s83_s1 = inlined_call_operand.vmem [shape: f32[8,1], index: 1, kind: input, shape index: {}]   ;;  %s84_s2 = inlined_call_operand.vmem [shape: f32[8,1], index: 2, kind: input, shape index: {}]   ;;  %s85_s0 = inlined_call_operand.vmem [shape: bf16[8,256], index: 0, kind: input, shape index: {}]   ;;  %s86_s3 = inlined_call_operand.vmem [shape: f32[8,256], index: 3, kind: output, shape index: {}]  }
   0x1   :  { %46 = vset.pattern.permute.xlu0 %v47_v0  ;;  %v17_v1 = vld [vmem:[%s83_s1] sm:$0xff] }
   0x2   :  { %20 = vperm.xlu0 %46, %v17_v1   ;;  %v25_v2 = vld [vmem:[%s84_s2] sm:$0xff] }
   0x3   :  { %v14_v3 = vld [vmem:[%s85_s0] sm:$0xff] }
   0x4   :  { %v15_v4 = vunpack.c.l.bf16 %v14_v3  ;;  %v16_v5 = vunpack.c.h.bf16 %v14_v3 }
   0x6   :  { %28 = vperm.xlu0 %46, %v25_v2  }
  0x7d   :  { %v21_v6 = vpop.permute.xlu0 %20 }
  0x7e   :  { %v23_v7 = vmul.f32 %v21_v6, %v15_v4  ;;  %v24_v8 = vmul.f32 %v21_v6, %v16_v5 }
  0x81   :  { %v29_v9 = vpop.permute.xlu0 %28 }
  0x82   :  { %v31_v10 = vadd.f32 %v29_v9, %v23_v7  ;;  %v32_v11 = vadd.f32 %v29_v9, %v24_v8 }
  0x84   :  { %vm33_vm0 = vcmp.gt.f32.partialorder %v31_v10, 0.0  ;;  %vm34_vm1 = vcmp.gt.f32.partialorder %v32_v11, 0.0  ;;  %v35_v12 = vmul.f32 0.3, %v31_v10  ;;  %v36_v13 = vmul.f32 0.3, %v32_v11 }
  0x86   :  { %v37_v14 = vsel %vm33_vm0, %v31_v10, %v35_v12  ;;  %v38_v15 = vsel %vm34_vm1, %v32_v11, %v36_v13 }
  0x87   :  { %39 = vst [vmem:[%s86_s3] sm:$0xff] %v37_v14  ;;  %40 = vst [vmem:[%s86_s3 + $0x8] sm:$0xff] %v38_v15 }

// kernel: downsampling_forward.2
= control target key start
LH: loop header
LB: loop body
LE: loop exit
PB: predicated region body
PF: predicated region fallthrough
CT: control target
= control target key end

     0   :  { %v998_v1 = vmov 0   ;;  %s999_s19 = smov 127   ;;  %vm310_vm0 = vcmask 1041408   ;;  %vm306_vm1 = vcmask 31744   ;;  %s1001_s13 = smov 118   ;;  %vm416_vm2 = vcmask 1039360   ;;  %s1179_s6 = inlined_call_operand.vmem [shape: bf16[4,512], index: 6, kind: input, shape index: {}, may-alias: {2,6}]   ;;  %s1180_s2 = inlined_call_operand.vmem [shape: bf16[4,512], index: 2, kind: input, shape index: {}, may-alias: {2,6}]   ;;  %s1181_s4 = inlined_call_operand.vmem [shape: bf16[4,512], index: 4, kind: input, shape index: {}, may-alias: {4,8}]   ;;  %s1182_s3 = inlined_call_operand.vmem [shape: bf16[4,512], index: 3, kind: input, shape index: {}, may-alias: {3,7}]   ;;  %s1183_s8 = inlined_call_operand.vmem [shape: bf16[4,512], index: 8, kind: input, shape index: {}, may-alias: {4,8}]   ;;  %s1184_s1 = inlined_call_operand.vmem [shape: bf16[9,8,4], index: 1, kind: input, shape index: {}]   ;;  %s1185_s7 = inlined_call_operand.vmem [shape: bf16[4,512], index: 7, kind: input, shape index: {}, may-alias: {3,7}]   ;;  %s1186_s5 = inlined_call_operand.vmem [shape: bf16[4,512], index: 5, kind: input, shape index: {}]   ;;  %s1187_s10 = inlined_call_operand.vmem [shape: f32[1,8,1], index: 10, kind: output, shape index: {1}]   ;;  %s1188_s0 = inlined_call_operand.vmem [shape: f32[1,256], index: 0, kind: input, shape index: {}]   ;;  %s1189_s9 = inlined_call_operand.vmem [shape: bf16[8,256], index: 9, kind: output, shape index: {0}]   ;;  %s1190_s11 = inlined_call_operand.vmem [shape: f32[1,8,1], index: 11, kind: output, shape index: {2}]  }
   0x1   :  { %v959_v0 = vld.sshfl [vmem:[%s1179_s6 + $0x4] sm:$0x33 pattern:$0x76325410]  ;;  %349 = vmatprep.mubr.bf16.mxu0 %v998_v1  ;;  %399 = vmatprep.mubr.bf16.mxu1 %v998_v1  ;;  %v303_v10 = vld [vmem:[%s1184_s1] sm:$0xf] }
   0x2   :  { %414 = vrot.lane.b32.xlu1 %v959_v0, %s999_s19  ;;  %v958_v2 = vld.sshfl [vmem:[%s1180_s2] sm:$0x33 pattern:$0x76325410]  ;;  %v964_v13 = vld [vmem:[%s1184_s1 + $0x4] sm:$0xf] }
   0x3   :  { %410 = vrot.lane.b32.xlu0 %v958_v2, %s999_s19  ;;  %v960_v3 = vld.sshfl [vmem:[%s1181_s4] sm:$0x33 pattern:$0x76325410]  ;;  %v260_v4 = vcombine.high %v958_v2, %v958_v2  ;;  %v362_v5 = vsel %vm310_vm0, %v958_v2, 0  ;;  %vm658_vm3 = vcmask 973824  }
   0x4   :  { %v277_v6 = vcombine.high %v960_v3, %v960_v3  ;;  %v962_v7 = vld.sshfl [vmem:[%s1182_s3] sm:$0x33 pattern:$0x76325410]  ;;  %v477_v12 = vsel %vm310_vm0, %v960_v3, 0  ;;  %vm783_vm4 = vcmask 965632  }
   0x5   :  { %967 = vmatprep.subr.msk.bf16.mxu1 %vm310_vm0, %v260_v4  ;;  %v294_v8 = vcombine.high %v962_v7, %v962_v7  ;;  %v312_v9 = vsel %vm310_vm0, %v962_v7, 0  ;;  %v961_v11 = vld.sshfl [vmem:[%s1183_s8 + $0x4] sm:$0x33 pattern:$0x76325410]  ;;  %s1000_s8 = smov 119  }
   0x6   :  { %590 = vrot.lane.b32.xlu1 %v960_v3, %s999_s19  ;;  %382 = vmatpush1.bf16.msra.mxu1 %v362_v5  ;;  %v972_v14 = vld [vmem:[%s1184_s1 + $0xc] sm:$0xf]  ;;  %v963_v15 = vld.sshfl [vmem:[%s1185_s7 + $0x4] sm:$0x33 pattern:$0x76325410] }
   0x7   :  { %412 = vrot.lane.b32.xlu0 %v260_v4, %s999_s19  ;;  %973 = vmatprep.subr.msk.bf16.mxu1 %vm310_vm0, %v277_v6  ;;  %v976_v18 = vld.sshfl [vmem:[%s1186_s5] sm:$0x33 pattern:$0x76325410]  ;;  %v969_v26 = vld [vmem:[%s1184_s1 + $0x8] sm:$0xf] }
   0x8   :  { %965 = vmatprep.subr.msk.bf16.mxu0 %vm310_vm0, %v294_v8  ;;  %v535_v21 = vcombine.high %v976_v18, %v976_v18  ;;  %v540_v28 = vsel %vm310_vm0, %v976_v18, 0  ;;  %v979_v33 = vld [vmem:[%s1184_s1 + $0x14] sm:$0xf]  ;;  %v975_v37 = vld [vmem:[%s1184_s1 + $0x10] sm:$0xf]  ;;  %vm242_vm5 = vcmask 7168  }
   0x9   :  { %332 = vmatpush1.bf16.msra.mxu0 %v312_v9  ;;  %968 = vmatmul.mubr.msk.bf16.vlgmr.msra.gmra.mxu1 %vm306_vm1, %v303_v10  ;;  %v982_v46 = vld [vmem:[%s1184_s1 + $0x18] sm:$0xf]  ;;  %v985_v47 = vld [vmem:[%s1184_s1 + $0x1c] sm:$0xf]  ;;  %v988_v54 = vld [vmem:[%s1184_s1 + $0x20] sm:$0xf] }
   0xa   :  { %594 = vrot.lane.b32.xlu1 %v961_v11, %s999_s19  ;;  %497 = vmatpush1.bf16.msra.mxu1 %v477_v12  ;;  %v1002_v5 = vmov 0.0  }
   0xb   :  { %592 = vrot.lane.b32.xlu0 %v277_v6, %s999_s19  ;;  %514 = vmatprep.mubr.bf16.mxu1 %v998_v1  ;;  %243 = vst.msk [vmem:[%s1187_s10] sm:$0xff] %vm242_vm5, %v1002_v5  ;;  %244 = vst.msk [vmem:[%s1190_s11] sm:$0xff] %vm242_vm5, %v1002_v5 }
   0xc   :  { %966 = vmatmul.mubr.msk.bf16.vlgmr.msra.gmra.mxu0 %vm306_vm1, %v964_v13 }
   0xd   :  { %460 = vmatprep.mubr.bf16.mxu0 %v998_v1 }
   0xe   :  { %654 = vrot.lane.b32.xlu1 %v260_v4, %s1000_s8 }
   0xf   :  { %652 = vrot.lane.b32.xlu0 %v958_v2, %s1000_s8 }
  0x11   :  { %974 = vmatmul.mubr.msk.bf16.vlgmr.msra.gmra.mxu1 %vm306_vm1, %v972_v14 }
  0x12   :  { %715 = vrot.lane.b32.xlu1 %v962_v7, %s1000_s8  ;;  %639 = vmatprep.mubr.bf16.mxu1 %v998_v1 }
  0x13   :  { %656 = vrot.lane.b32.xlu0 %v959_v0, %s1000_s8 }
  0x16   :  { %719 = vrot.lane.b32.xlu1 %v963_v15, %s1000_s8 }
  0x17   :  { %717 = vrot.lane.b32.xlu0 %v294_v8, %s1000_s8 }
  0x1a   :  { %779 = vrot.lane.b32.xlu1 %v260_v4, %s1001_s13 }
  0x1b   :  { %777 = vrot.lane.b32.xlu0 %v958_v2, %s1001_s13 }
  0x1f   :  { %781 = vrot.lane.b32.xlu0 %v959_v0, %s1001_s13 }
  0x74   :  { %v415_v16 = vpop.permute.xlu1 %414 }
  0x75   :  { %v411_v17 = vpop.permute.xlu0 %410 }
  0x78   :  { %v591_v19 = vpop.permute.xlu1 %590 }
  0x79   :  { %v413_v20 = vpop.permute.xlu0 %412 }
  0x7a   :  { %v417_v22 = vsel %vm416_vm2, %v411_v17, %v413_v20  ;;  %v418_v23 = vsel %vm416_vm2, %v413_v20, %v415_v16 }
  0x7b   :  { %v423_v24 = vsel %vm310_vm0, %v417_v22, 0  ;;  %970 = vmatprep.subr.msk.bf16.mxu0 %vm310_vm0, %v418_v23 }
  0x7c   :  { %443 = vmatpush1.bf16.msra.mxu0 %v423_v24  ;;  %v595_v25 = vpop.permute.xlu1 %594 }
  0x7d   :  { %v593_v27 = vpop.permute.xlu0 %592  ;;  %977 = vmatprep.subr.msk.bf16.mxu0 %vm310_vm0, %v535_v21 }
  0x7e   :  { %v596_v29 = vsel %vm416_vm2, %v591_v19, %v593_v27  ;;  %v597_v30 = vsel %vm416_vm2, %v593_v27, %v595_v25  ;;  %v849_v19 = vlaneseq }
  0x7f   :  { %v602_v31 = vsel %vm310_vm0, %v596_v29, 0  ;;  %971 = vmatmul.mubr.msk.bf16.vlgmr.msra.gmra.mxu0 %vm306_vm1, %v969_v26  ;;  %980 = vmatprep.subr.msk.bf16.mxu1 %vm310_vm0, %v597_v30 }
  0x80   :  { %622 = vmatpush1.bf16.msra.mxu1 %v602_v31  ;;  %v655_v32 = vpop.permute.xlu1 %654  ;;  %560 = vmatpush1.bf16.msra.mxu0 %v540_v28  ;;  %v850_v25 = vshrl.u32 %v849_v19, 7 }
  0x81   :  { %v653_v34 = vpop.permute.xlu0 %652  ;;  %577 = vmatprep.mubr.bf16.mxu0 %v998_v1 }
  0x82   :  { %v659_v35 = vsel %vm658_vm3, %v653_v34, %v655_v32 }
  0x83   :  { %981 = vmatmul.mubr.msk.bf16.vlgmr.msra.gmra.mxu1 %vm306_vm1, %v979_v33  ;;  %v665_v40 = vsel %vm310_vm0, %v659_v35, 0  ;;  %v851_v33 = vsub.s32 0, %v850_v25 }
  0x84   :  { %v716_v36 = vpop.permute.xlu1 %715  ;;  %764 = vmatprep.mubr.bf16.mxu1 %v998_v1 }
  0x85   :  { %v657_v38 = vpop.permute.xlu0 %656 }
  0x86   :  { %v660_v39 = vsel %vm658_vm3, %v655_v32, %v657_v38  ;;  %v855_v38 = vsub.s32 1, %v850_v25 }
  0x87   :  { %978 = vmatmul.mubr.msk.bf16.vlgmr.msra.gmra.mxu0 %vm306_vm1, %v975_v37  ;;  %983 = vmatprep.subr.msk.bf16.mxu0 %vm310_vm0, %v660_v39 }
  0x88   :  { %685 = vmatpush1.bf16.msra.mxu0 %v665_v40  ;;  %v720_v41 = vpop.permute.xlu1 %719  ;;  %702 = vmatprep.mubr.bf16.mxu0 %v998_v1 }
  0x89   :  { %v718_v42 = vpop.permute.xlu0 %717 }
  0x8a   :  { %v721_v43 = vsel %vm658_vm3, %v716_v36, %v718_v42  ;;  %v722_v44 = vsel %vm658_vm3, %v718_v42, %v720_v41  ;;  %v847_v36 = vld [vmem:[%s1188_s0] sm:$0x3] }
  0x8b   :  { %v727_v45 = vsel %vm310_vm0, %v721_v43, 0  ;;  %986 = vmatprep.subr.msk.bf16.mxu1 %vm310_vm0, %v722_v44  ;;  %v852_v42 = vrot.slane %v847_v36, %v851_v33 }
  0x8c   :  { %747 = vmatpush1.bf16.msra.mxu1 %v727_v45  ;;  %v780_v48 = vpop.permute.xlu1 %779 }
  0x8d   :  { %v778_v49 = vpop.permute.xlu0 %777 }
  0x8e   :  { %v784_v50 = vsel %vm783_vm4, %v778_v49, %v780_v48 }
  0x8f   :  { %984 = vmatmul.mubr.msk.bf16.vlgmr.msra.gmra.mxu0 %vm306_vm1, %v982_v46  ;;  %987 = vmatmul.mubr.msk.bf16.vlgmr.msra.gmra.mxu1 %vm306_vm1, %v985_v47  ;;  %v790_v53 = vsel %vm310_vm0, %v784_v50, 0  ;;  %v856_v46 = vrot.slane %v847_v36, %v855_v38 }
  0x90   :  { %827 = vmatprep.mubr.bf16.mxu0 %v998_v1 }
  0x91   :  { %v782_v51 = vpop.permute.xlu0 %781 }
  0x92   :  { %v785_v52 = vsel %vm783_vm4, %v780_v48, %v782_v51 }
  0x93   :  { %989 = vmatprep.subr.msk.bf16.mxu0 %vm310_vm0, %v785_v52 }
  0x94   :  { %810 = vmatpush1.bf16.msra.mxu0 %v790_v53 }
  0x97   :  { %990 = vmatmul.mubr.msk.bf16.vlgmr.msra.gmra.mxu0 %vm306_vm1, %v988_v54 }
  0xc9   :  { %v401_v55 = vpop.f32.mrf.mxu1 }
  0xcb   :  { %v403_v56 = vpop.f32.mrf.mxu1 }
  0xcc   :  { %v351_v57 = vpop.f32.mrf.mxu0 }
  0xcd   :  { %v402_v58 = vadd.f32 %v401_v55, %v351_v57  ;;  %v405_v59 = vpop.f32.mrf.mxu1 }
  0xce   :  { %v353_v60 = vpop.f32.mrf.mxu0 }
  0xcf   :  { %v404_v61 = vadd.f32 %v403_v56, %v353_v60  ;;  %v406_v62 = vpop.f32.mrf.mxu1  ;;  %v868_v60 = vld [vmem:[%s1190_s11] sm:$0xff] }
  0xd0   :  { %v355_v63 = vpop.f32.mrf.mxu0 }
  0xd1   :  { %v516_v0 = vpop.f32.mrf.mxu1 }
  0xd2   :  { %v356_v1 = vpop.f32.mrf.mxu0 }
  0xd3   :  { %v518_v2 = vpop.f32.mrf.mxu1 }
  0xd5   :  { %v520_v3 = vpop.f32.mrf.mxu1 }
  0xd7   :  { %v521_v4 = vpop.f32.mrf.mxu1 }
 0x13f   :  { %v462_v6 = vpop.f32.mrf.mxu0 }
 0x140   :  { %v469_v12 = vadd.f32 %v462_v6, %v402_v58  ;;  %v861_v58 = vld [vmem:[%s1187_s10] sm:$0xff] }
 0x141   :  { %v464_v7 = vpop.f32.mrf.mxu0 }
 0x142   :  { %v470_v15 = vadd.f32 %v464_v7, %v404_v61  ;;  %v523_v18 = vadd.f32 %v516_v0, %v469_v12 }
 0x143   :  { %v466_v8 = vpop.f32.mrf.mxu0  ;;  %v641_v9 = vpop.f32.mrf.mxu1 }
 0x144   :  { %v524_v21 = vadd.f32 %v518_v2, %v470_v15 }
 0x145   :  { %v467_v10 = vpop.f32.mrf.mxu0  ;;  %v643_v11 = vpop.f32.mrf.mxu1 }
 0x147   :  { %v579_v13 = vpop.f32.mrf.mxu0  ;;  %v645_v14 = vpop.f32.mrf.mxu1 }
 0x148   :  { %v586_v22 = vadd.f32 %v579_v13, %v523_v18 }
 0x149   :  { %v581_v16 = vpop.f32.mrf.mxu0  ;;  %v646_v17 = vpop.f32.mrf.mxu1 }
 0x14a   :  { %v587_v24 = vadd.f32 %v581_v16, %v524_v21  ;;  %v648_v28 = vadd.f32 %v641_v9, %v586_v22 }
 0x14b   :  { %v583_v20 = vpop.f32.mrf.mxu0 }
 0x14c   :  { %v649_v31 = vadd.f32 %v643_v11, %v587_v24 }
 0x14d   :  { %v584_v23 = vpop.f32.mrf.mxu0 }
 0x14f   :  { %v704_v26 = vpop.f32.mrf.mxu0  ;;  %v766_v27 = vpop.f32.mrf.mxu1 }
 0x150   :  { %v711_v32 = vadd.f32 %v704_v26, %v648_v28 }
 0x151   :  { %v706_v29 = vpop.f32.mrf.mxu0  ;;  %v768_v30 = vpop.f32.mrf.mxu1 }
 0x152   :  { %v712_v37 = vadd.f32 %v706_v29, %v649_v31  ;;  %v773_v41 = vadd.f32 %v766_v27, %v711_v32 }
 0x153   :  { %v708_v34 = vpop.f32.mrf.mxu0  ;;  %v770_v35 = vpop.f32.mrf.mxu1 }
 0x154   :  { %v774_v44 = vadd.f32 %v768_v30, %v712_v37 }
 0x155   :  { %v709_v39 = vpop.f32.mrf.mxu0  ;;  %v771_v40 = vpop.f32.mrf.mxu1 }
 0x157   :  { %v829_v43 = vpop.f32.mrf.mxu0 }
 0x158   :  { %v836_v45 = vadd.f32 %v829_v43, %v773_v41 }
 0x159   :  { %v831_v47 = vpop.f32.mrf.mxu0 }
 0x15a   :  { %v837_v48 = vadd.f32 %v831_v47, %v774_v44  ;;  %v859_v49 = vmul.f32 %v852_v42, %v836_v45 }
 0x15b   :  { %v833_v50 = vpop.f32.mrf.mxu0 }
 0x15c   :  { %v992_v51 = vpack.c.bf16 %v837_v48, %v836_v45  ;;  %v860_v52 = vmul.f32 %v856_v46, %v837_v48  ;;  %v869_v55 = vmul.f32 %v859_v49, %v836_v45 }
 0x15d   :  { %v834_v53 = vpop.f32.mrf.mxu0 }
 0x15e   :  { %846 = vst [vmem:[%s1189_s9] sm:$0xff] %v992_v51  ;;  %v862_v54 = vadd.f32 %v860_v52, %v859_v49  ;;  %v870_v56 = vmul.f32 %v860_v52, %v837_v48 }
 0x160   :  { %863 = vadd.xlane.f32.xlu1 %v862_v54  ;;  %v871_v57 = vadd.f32 %v870_v56, %v869_v55 }
 0x162   :  { %872 = vadd.xlane.f32.xlu0 %v871_v57 }
 0x1e9   :  { %v864_v59 = vpop.xlane.xlu1 %863 }
 0x1ea   :  { %v865_v61 = vadd.f32 %v864_v59, %v861_v58 }
 0x1eb   :  { %v873_v62 = vpop.xlane.xlu0 %872 }
 0x1ec   :  { %867 = vst.msk [vmem:[%s1187_s10] sm:$0xff] %vm242_vm5, %v865_v61  ;;  %v874_v63 = vadd.f32 %v873_v62, %v868_v60 }
 0x1ee   :  { %875 = vst.msk [vmem:[%s1190_s11] sm:$0xff] %vm242_vm5, %v874_v63 }

</bundles_post_ra>
